<compile_context>
chip_gen: v5e
topology: v5e:2x2
jax: 0.10.0
libtpu: 0.0.40
codegen_flags: <defaults>
</compile_context>

<pallas_src>
import functools

import jax
import jax.numpy as jnp
from jax.experimental import pallas as pl
from jax.experimental.pallas import tpu as pltpu


def _round_up(v, m):
    return ((v + m - 1) // m) * m


# ---------------------------------------------------------------------------
# LayerNorm kernel
# ---------------------------------------------------------------------------
def _ln_kernel(x_ref, g_ref, b_ref, o_ref, *, d):
    x = x_ref[...].astype(jnp.float32)                      # (tm, Dp)
    col = jax.lax.broadcasted_iota(jnp.int32, x.shape, 1)
    mask = (col < d).astype(jnp.float32)
    inv_d = 1.0 / d
    mean = jnp.sum(x * mask, axis=-1, keepdims=True) * inv_d
    xc = (x - mean) * mask
    var = jnp.sum(xc * xc, axis=-1, keepdims=True) * inv_d
    inv = jax.lax.rsqrt(var + 1e-6)
    y = xc * inv * g_ref[...].astype(jnp.float32) + b_ref[...].astype(jnp.float32)
    o_ref[...] = y.astype(o_ref.dtype)


@functools.partial(jax.jit, static_argnames=("tm",))
def layernorm_pallas(x, g, b, *, tm=256):
    M, D = x.shape
    tm = min(tm, _round_up(M, 8))
    Mp = _round_up(M, tm)
    Dp = _round_up(D, 128)
    xp = jnp.pad(x, ((0, Mp - M), (0, Dp - D)))
    gp = jnp.pad(g.reshape(1, D), ((0, 0), (0, Dp - D)))
    bp = jnp.pad(b.reshape(1, D), ((0, 0), (0, Dp - D)))
    out = pl.pallas_call(
        functools.partial(_ln_kernel, d=D),
        out_shape=jax.ShapeDtypeStruct((Mp, Dp), x.dtype),
        grid_spec=pltpu.PrefetchScalarGridSpec(
            num_scalar_prefetch=0,
            grid=(Mp // tm,),
            in_specs=[
                pl.BlockSpec((tm, Dp), lambda i: (i, 0)),
                pl.BlockSpec((1, Dp), lambda i: (0, 0)),
                pl.BlockSpec((1, Dp), lambda i: (0, 0)),
            ],
            out_specs=pl.BlockSpec((tm, Dp), lambda i: (i, 0)),
        ),
        compiler_params=pltpu.CompilerParams(dimension_semantics=("parallel",)),
    )(xp, gp, bp)
    return out[:M, :D]


# ---------------------------------------------------------------------------
# Linear (+ optional residual) kernels
# ---------------------------------------------------------------------------
def _linear_kernel(x_ref, w_ref, b_ref, o_ref):
    acc = jnp.dot(x_ref[...], w_ref[...], preferred_element_type=jnp.float32)
    o_ref[...] = (acc + b_ref[...].astype(jnp.float32)).astype(o_ref.dtype)


def _linear_resid_kernel(x_ref, w_ref, b_ref, r_ref, o_ref):
    acc = jnp.dot(x_ref[...], w_ref[...], preferred_element_type=jnp.float32)
    acc = acc + b_ref[...].astype(jnp.float32) + r_ref[...].astype(jnp.float32)
    o_ref[...] = acc.astype(o_ref.dtype)


@functools.partial(jax.jit, static_argnames=("tm",))
def linear_pallas(x, w, b, *, tm=256):
    M, Din = x.shape
    Dout = w.shape[1]
    tm = min(tm, _round_up(M, 8))
    Mp = _round_up(M, tm)
    Dip = _round_up(Din, 128)
    Dop = _round_up(Dout, 128)
    xp = jnp.pad(x, ((0, Mp - M), (0, Dip - Din)))
    wp = jnp.pad(w, ((0, Dip - Din), (0, Dop - Dout)))
    bp = jnp.pad(b.reshape(1, Dout), ((0, 0), (0, Dop - Dout)))
    out = pl.pallas_call(
        _linear_kernel,
        out_shape=jax.ShapeDtypeStruct((Mp, Dop), x.dtype),
        grid_spec=pltpu.PrefetchScalarGridSpec(
            num_scalar_prefetch=0,
            grid=(Mp // tm,),
            in_specs=[
                pl.BlockSpec((tm, Dip), lambda i: (i, 0)),
                pl.BlockSpec((Dip, Dop), lambda i: (0, 0)),
                pl.BlockSpec((1, Dop), lambda i: (0, 0)),
            ],
            out_specs=pl.BlockSpec((tm, Dop), lambda i: (i, 0)),
        ),
        compiler_params=pltpu.CompilerParams(dimension_semantics=("parallel",)),
    )(xp, wp, bp)
    return out[:M, :Dout]


@functools.partial(jax.jit, static_argnames=("tm",))
def linear_resid_pallas(x, w, b, r, *, tm=256):
    M, Din = x.shape
    Dout = w.shape[1]
    tm = min(tm, _round_up(M, 8))
    Mp = _round_up(M, tm)
    Dip = _round_up(Din, 128)
    Dop = _round_up(Dout, 128)
    xp = jnp.pad(x, ((0, Mp - M), (0, Dip - Din)))
    wp = jnp.pad(w, ((0, Dip - Din), (0, Dop - Dout)))
    bp = jnp.pad(b.reshape(1, Dout), ((0, 0), (0, Dop - Dout)))
    rp = jnp.pad(r, ((0, Mp - M), (0, Dop - Dout)))
    out = pl.pallas_call(
        _linear_resid_kernel,
        out_shape=jax.ShapeDtypeStruct((Mp, Dop), x.dtype),
        grid_spec=pltpu.PrefetchScalarGridSpec(
            num_scalar_prefetch=0,
            grid=(Mp // tm,),
            in_specs=[
                pl.BlockSpec((tm, Dip), lambda i: (i, 0)),
                pl.BlockSpec((Dip, Dop), lambda i: (0, 0)),
                pl.BlockSpec((1, Dop), lambda i: (0, 0)),
                pl.BlockSpec((tm, Dop), lambda i: (i, 0)),
            ],
            out_specs=pl.BlockSpec((tm, Dop), lambda i: (i, 0)),
        ),
        compiler_params=pltpu.CompilerParams(dimension_semantics=("parallel",)),
    )(xp, wp, bp, rp)
    return out[:M, :Dout]


# ---------------------------------------------------------------------------
# Multi-head softmax attention kernel (one batch sample, all heads per step)
# ---------------------------------------------------------------------------
def _attn_kernel(q_ref, k_ref, v_ref, o_ref, *, scale):
    q = q_ref[0].astype(jnp.float32)                        # (H, N, hd)
    k = k_ref[0].astype(jnp.float32)
    v = v_ref[0]
    s = jnp.einsum("hqd,hkd->hqk", q, k, preferred_element_type=jnp.float32) * scale
    s = s - jnp.max(s, axis=-1, keepdims=True)
    p = jnp.exp(s)
    p = p / jnp.sum(p, axis=-1, keepdims=True)
    o = jnp.einsum("hqk,hkd->hqd", p.astype(v.dtype), v,
                   preferred_element_type=jnp.float32)
    o_ref[0] = o.astype(o_ref.dtype)


@jax.jit
def attention_pallas(q, k, v):
    # q, k, v: (B, H, N, hd)
    B, H, N, hd = q.shape
    scale = float(hd) ** -0.5
    return pl.pallas_call(
        functools.partial(_attn_kernel, scale=scale),
        out_shape=jax.ShapeDtypeStruct((B, H, N, hd), q.dtype),
        grid_spec=pltpu.PrefetchScalarGridSpec(
            num_scalar_prefetch=0,
            grid=(B,),
            in_specs=[
                pl.BlockSpec((1, H, N, hd), lambda b: (b, 0, 0, 0)),
                pl.BlockSpec((1, H, N, hd), lambda b: (b, 0, 0, 0)),
                pl.BlockSpec((1, H, N, hd), lambda b: (b, 0, 0, 0)),
            ],
            out_specs=pl.BlockSpec((1, H, N, hd), lambda b: (b, 0, 0, 0)),
        ),
        compiler_params=pltpu.CompilerParams(dimension_semantics=("parallel",)),
    )(q, k, v)


# ---------------------------------------------------------------------------
# Fused LayerNorm -> fc1 -> GELU(exact) -> fc2 -> +residual  (the MLP branch)
# ---------------------------------------------------------------------------
def _ln_mlp_kernel(x_ref, g_ref, be_ref, w1_ref, b1_ref, w2_ref, b2_ref, o_ref,
                   acc_ref, xn_ref, *, d):
    j = pl.program_id(1)

    @pl.when(j == 0)
    def _():
        x = x_ref[...].astype(jnp.float32)
        col = jax.lax.broadcasted_iota(jnp.int32, x.shape, 1)
        mask = (col < d).astype(jnp.float32)
        inv_d = 1.0 / d
        mean = jnp.sum(x * mask, axis=-1, keepdims=True) * inv_d
        xc = (x - mean) * mask
        var = jnp.sum(xc * xc, axis=-1, keepdims=True) * inv_d
        inv = jax.lax.rsqrt(var + 1e-6)
        xn_ref[...] = (xc * inv * g_ref[...].astype(jnp.float32)
                       + be_ref[...].astype(jnp.float32))
        acc_ref[...] = jnp.zeros_like(acc_ref)

    # fc1 on this hidden slice, f32 accumulation on the MXU.
    h = jnp.dot(xn_ref[...].astype(w1_ref.dtype), w1_ref[...],
                preferred_element_type=jnp.float32)
    h = h + b1_ref[...].astype(jnp.float32)
    # Exact GELU (PyTorch nn.GELU default): 0.5*x*(1+erf(x/sqrt(2))).
    h = 0.5 * h * (1.0 + jax.lax.erf(h * 0.7071067811865476))
    # fc2 partial product over this hidden slice.
    acc_ref[...] += jnp.dot(h.astype(w2_ref.dtype), w2_ref[...],
                            preferred_element_type=jnp.float32)

    @pl.when(j == pl.num_programs(1) - 1)
    def _():
        o_ref[...] = (acc_ref[...] + b2_ref[...].astype(jnp.float32)
                      + x_ref[...].astype(jnp.float32)).astype(o_ref.dtype)


@functools.partial(jax.jit, static_argnames=("tm", "th"))
def ln_mlp_resid_pallas(x, g, be, w1, b1, w2, b2, *, tm=256, th=512):
    """out = x + fc2(gelu(fc1(layernorm(x)))). Requires D_out == D_in (residual)."""
    M, D = x.shape
    H = w1.shape[1]
    assert w2.shape[1] == D, "residual requires in_features == out_features"

    tm = min(tm, _round_up(M, 8))
    Mp = _round_up(M, tm)
    Dp = _round_up(D, 128)
    Hp = _round_up(H, 128)
    if Hp <= th:
        th = Hp
    elif Hp % th != 0:
        th = 128  # Hp is a multiple of 128 by construction

    xp = jnp.pad(x, ((0, Mp - M), (0, Dp - D)))
    gp = jnp.pad(g.reshape(1, D), ((0, 0), (0, Dp - D)))
    bep = jnp.pad(be.reshape(1, D), ((0, 0), (0, Dp - D)))
    w1p = jnp.pad(w1, ((0, Dp - D), (0, Hp - H)))
    b1p = jnp.pad(b1.reshape(1, H), ((0, 0), (0, Hp - H)))
    w2p = jnp.pad(w2, ((0, Hp - H), (0, Dp - D)))
    b2p = jnp.pad(b2.reshape(1, D), ((0, 0), (0, Dp - D)))

    grid = (Mp // tm, Hp // th)

    isz = jnp.dtype(x.dtype).itemsize
    tile_bytes = 2 * isz * (tm * Dp + Dp * th + th + th * Dp + Dp + tm * Dp)
    tile_bytes += 4 * tm * (Dp + Dp)           # f32 scratch: accumulator + LN cache
    vmem_limit = int(min(64 * 2 ** 20, max(32 * 2 ** 20, 2 * tile_bytes)))

    cost = pl.CostEstimate(
        flops=2 * M * (D * H + H * D),
        transcendentals=M * H,
        bytes_accessed=isz * (2 * M * D + 2 * D * H + H + 2 * D),
    )

    out = pl.pallas_call(
        functools.partial(_ln_mlp_kernel, d=D),
        out_shape=jax.ShapeDtypeStruct((Mp, Dp), x.dtype),
        grid_spec=pltpu.PrefetchScalarGridSpec(
            num_scalar_prefetch=0,
            grid=grid,
            in_specs=[
                pl.BlockSpec((tm, Dp), lambda i, j: (i, 0)),   # x (kept across j)
                pl.BlockSpec((1, Dp), lambda i, j: (0, 0)),    # ln gamma
                pl.BlockSpec((1, Dp), lambda i, j: (0, 0)),    # ln beta
                pl.BlockSpec((Dp, th), lambda i, j: (0, j)),   # fc1 weight slice
                pl.BlockSpec((1, th), lambda i, j: (0, j)),    # fc1 bias slice
                pl.BlockSpec((th, Dp), lambda i, j: (j, 0)),   # fc2 weight slice
                pl.BlockSpec((1, Dp), lambda i, j: (0, 0)),    # fc2 bias
            ],
            out_specs=pl.BlockSpec((tm, Dp), lambda i, j: (i, 0)),
            scratch_shapes=[pltpu.VMEM((tm, Dp), jnp.float32),
                            pltpu.VMEM((tm, Dp), jnp.float32)],
        ),
        compiler_params=pltpu.CompilerParams(
            dimension_semantics=("parallel", "arbitrary"),
            vmem_limit_bytes=vmem_limit,
        ),
        cost_estimate=cost,
    )(xp, gp, bep, w1p, b1p, w2p, b2p)
    return out[:M, :D]


# ---------------------------------------------------------------------------
# Patch embedding / reconstruction (pure index manipulation, done in JAX)
# ---------------------------------------------------------------------------
def _patchify(x, patch_size):
    b, c, h, w = x.shape
    hp = -(-h // patch_size)
    wp = -(-w // patch_size)
    h_pad = hp * patch_size - h
    w_pad = wp * patch_size - w
    if h_pad or w_pad:
        x = jnp.pad(x, ((0, 0), (0, 0), (0, h_pad), (0, w_pad)), mode="reflect")
    xr = x.reshape(b, c, hp, patch_size, wp, patch_size)
    xr = xr.transpose(0, 2, 4, 1, 3, 5)                     # (b, hp, wp, c, ps, ps)
    tokens = xr.reshape(b, hp * wp, c * patch_size * patch_size)
    return tokens, (hp, wp, h_pad, w_pad)


def _unpatchify(tokens, pads, patch_size, channels):
    hp, wp, h_pad, w_pad = pads
    b, n, d = tokens.shape
    xr = tokens.reshape(b, hp, wp, channels, patch_size, patch_size)
    xr = xr.transpose(0, 3, 1, 4, 2, 5)                     # (b, c, hp, ps, wp, ps)
    img = xr.reshape(b, channels, hp * patch_size, wp * patch_size)
    return img[:, :, : hp * patch_size - h_pad, : wp * patch_size - w_pad]


# ---------------------------------------------------------------------------
# Full cross_encoder forward (Pallas kernels for all compute)
# ---------------------------------------------------------------------------
def cross_encoder_pallas(x1, x2, params, *, patch_size, n_heads):
    c = x1.shape[1]
    t1, pads = _patchify(x1, patch_size)
    t2, _ = _patchify(x2, patch_size)
    B, N, D = t1.shape
    hd = D // n_heads

    def to2d(t):
        return t.reshape(B * N, D)

    def to3d(t):
        return t.reshape(B, N, D)

    # cross_atten_module: pos_drop(p=0) is identity; x = [x1, x2, x2]
    x0, xa, xb = t1, t2, t2
    for blk in params["blocks"]:
        # norm1 applied to all three streams (same params)
        x0n = to3d(layernorm_pallas(to2d(x0), blk["ln1_g"], blk["ln1_b"]))
        xan = to3d(layernorm_pallas(to2d(xa), blk["ln1_g"], blk["ln1_b"]))
        xbn = to3d(layernorm_pallas(to2d(xb), blk["ln1_g"], blk["ln1_b"]))
        # cross attention: q from x_[0], k from x_[1], v from x_[2]
        q = linear_pallas(to2d(x0n), blk["wq"], blk["bq"])
        k = linear_pallas(to2d(xan), blk["wk"], blk["bk"])
        v = linear_pallas(to2d(xbn), blk["wv"], blk["bv"])
        qh = to3d(q).reshape(B, N, n_heads, hd).transpose(0, 2, 1, 3)
        kh = to3d(k).reshape(B, N, n_heads, hd).transpose(0, 2, 1, 3)
        vh = to3d(v).reshape(B, N, n_heads, hd).transpose(0, 2, 1, 3)
        oh = attention_pallas(qh, kh, vh)                   # (B, H, N, hd)
        attn_flat = oh.transpose(0, 2, 1, 3).reshape(B * N, D)
        # out = x[2] + proj(attn); then out = out + mlp(norm2(out))
        out2d = linear_resid_pallas(attn_flat, blk["wp"], blk["bp"], to2d(xb))
        out2d = ln_mlp_resid_pallas(out2d, blk["ln2_g"], blk["ln2_b"],
                                    blk["w1"], blk["b1"], blk["w2"], blk["b2"])
        out = to3d(out2d)
        # module-level norm applied to x[2] after every block
        xb_new = to3d(layernorm_pallas(out2d, params["norm_g"], params["norm_b"]))
        x0, xa, xb = x0n, out, xb_new

    return _unpatchify(xb, pads, patch_size, c)


# ---------------------------------------------------------------------------
# Pure-JAX reference (same math, same weight layout)
# ---------------------------------------------------------------------------
def _layernorm_ref(x, g, b, eps=1e-6):
    mu = jnp.mean(x, axis=-1, keepdims=True)
    var = jnp.mean((x - mu) ** 2, axis=-1, keepdims=True)
    return (x - mu) * jax.lax.rsqrt(var + eps) * g + b


def cross_encoder_reference(x1, x2, params, *, patch_size, n_heads):
    c = x1.shape[1]
    t1, pads = _patchify(x1, patch_size)
    t2, _ = _patchify(x2, patch_size)
    B, N, D = t1.shape
    hd = D // n_heads
    scale = float(hd) ** -0.5
    x0, xa, xb = t1, t2, t2
    for blk in params["blocks"]:
        x0n = _layernorm_ref(x0, blk["ln1_g"], blk["ln1_b"])
        xan = _layernorm_ref(xa, blk["ln1_g"], blk["ln1_b"])
        xbn = _layernorm_ref(xb, blk["ln1_g"], blk["ln1_b"])
        q = x0n @ blk["wq"] + blk["bq"]
        k = xan @ blk["wk"] + blk["bk"]
        v = xbn @ blk["wv"] + blk["bv"]
        qh = q.reshape(B, N, n_heads, hd).transpose(0, 2, 1, 3)
        kh = k.reshape(B, N, n_heads, hd).transpose(0, 2, 1, 3)
        vh = v.reshape(B, N, n_heads, hd).transpose(0, 2, 1, 3)
        s = jnp.einsum("bhqd,bhkd->bhqk", qh, kh) * scale
        p = jax.nn.softmax(s, axis=-1)
        o = jnp.einsum("bhqk,bhkd->bhqd", p, vh)
        o = o.transpose(0, 2, 1, 3).reshape(B, N, D)
        out = xb + (o @ blk["wp"] + blk["bp"])
        h = _layernorm_ref(out, blk["ln2_g"], blk["ln2_b"])
        h = h @ blk["w1"] + blk["b1"]
        h = jax.nn.gelu(h, approximate=False)
        h = h @ blk["w2"] + blk["b2"]
        out = out + h
        x0, xa, xb = x0n, out, _layernorm_ref(out, params["norm_g"], params["norm_b"])
    return _unpatchify(xb, pads, patch_size, c)


if __name__ == "__main__":
    # Small shapes consistent with the module: embed_dim = c * patch_size^2,
    # hidden = 4*embed_dim, 16 heads; image size not a multiple of patch_size so the
    # reflection-padding path is exercised.
    B, C = 2, 1
    IMG = 24
    PATCH = 16
    N_HEADS = 16
    MLP_RATIO = 4
    DEPTH_CROSS = 1
    D = C * PATCH * PATCH              # 256
    HID = int(D * MLP_RATIO)           # 1024

    key = jax.random.PRNGKey(0)
    keys = list(jax.random.split(key, 32))
    kit = iter(keys)

    x1 = jax.random.normal(next(kit), (B, C, IMG, IMG), dtype=jnp.float32)
    x2 = jax.random.normal(next(kit), (B, C, IMG, IMG), dtype=jnp.float32)

    def linear_init(k, fan_in, fan_out):
        k1, k2 = jax.random.split(k)
        lim = 1.0 / jnp.sqrt(jnp.float32(fan_in))
        w = jax.random.uniform(k1, (fan_in, fan_out), jnp.float32, -lim, lim)
        b = jax.random.uniform(k2, (fan_out,), jnp.float32, -lim, lim)
        return w, b

    blocks = []
    for _ in range(DEPTH_CROSS):
        wq, bq = linear_init(next(kit), D, D)
        wk, bk = linear_init(next(kit), D, D)
        wv, bv = linear_init(next(kit), D, D)
        wp_, bp_ = linear_init(next(kit), D, D)
        w1, b1 = linear_init(next(kit), D, HID)
        w2, b2 = linear_init(next(kit), HID, D)
        ln1_g = 1.0 + 0.1 * jax.random.normal(next(kit), (D,), jnp.float32)
        ln1_b = 0.1 * jax.random.normal(next(kit), (D,), jnp.float32)
        ln2_g = 1.0 + 0.1 * jax.random.normal(next(kit), (D,), jnp.float32)
        ln2_b = 0.1 * jax.random.normal(next(kit), (D,), jnp.float32)
        blocks.append(dict(wq=wq, bq=bq, wk=wk, bk=bk, wv=wv, bv=bv,
                           wp=wp_, bp=bp_, w1=w1, b1=b1, w2=w2, b2=b2,
                           ln1_g=ln1_g, ln1_b=ln1_b, ln2_g=ln2_g, ln2_b=ln2_b))
    norm_g = 1.0 + 0.1 * jax.random.normal(next(kit), (D,), jnp.float32)
    norm_b = 0.1 * jax.random.normal(next(kit), (D,), jnp.float32)
    params = dict(blocks=blocks, norm_g=norm_g, norm_b=norm_b)

    out = cross_encoder_pallas(x1, x2, params, patch_size=PATCH, n_heads=N_HEADS)
    out = jax.block_until_ready(out)

    ref = cross_encoder_reference(x1, x2, params, patch_size=PATCH, n_heads=N_HEADS)
    assert out.shape == (B, C, IMG, IMG), f"bad output shape {out.shape}"
    max_err = float(jnp.max(jnp.abs(out - ref)))
    assert jnp.allclose(out, ref, atol=1e-3, rtol=1e-3), f"mismatch vs reference: {max_err}"

    print("KERNEL_OK")
</pallas_src>

<mosaic_0001>
module attributes {stable_mosaic.version = 11 : i64} {
  func.func @_ln_kernel(%arg0: i32, %arg1: memref<8x256xf32, #tpu.memory_space<vmem>>, %arg2: memref<1x256xf32, #tpu.memory_space<vmem>>, %arg3: memref<1x256xf32, #tpu.memory_space<vmem>>, %arg4: memref<8x256xf32, #tpu.memory_space<vmem>>) attributes {dimension_semantics = [#tpu.dimension_semantics<parallel>], iteration_bounds = array<i64: 1>, scalar_prefetch = 0 : i64, scratch_operands = 0 : i64, tpu.core_type = #tpu.core_type<tc>, window_params = [{transform_indices = @transform_0, window_bounds = array<i64: 8, 256>}, {pipeline_mode = #tpu.pipeline_mode<synchronous>, transform_indices = @transform_1, window_bounds = array<i64: 1, 256>}, {pipeline_mode = #tpu.pipeline_mode<synchronous>, transform_indices = @transform_2, window_bounds = array<i64: 1, 256>}, {transform_indices = @transform_3, window_bounds = array<i64: 8, 256>}]} {
    %c0 = arith.constant 0 : index
    %c0_0 = arith.constant 0 : index
    %0 = vector.load %arg1[%c0, %c0_0] : memref<8x256xf32, #tpu.memory_space<vmem>>, vector<8x256xf32>
    %1 = tpu.iota {dimensions = array<i32: 1>} : vector<8x256xi32>
    %c256_i32 = arith.constant 256 : i32
    %2 = vector.broadcast %c256_i32 : i32 to vector<8x256xi32>
    %3 = arith.cmpi slt, %1, %2 : vector<8x256xi32>
    %4 = arith.extui %3 : vector<8x256xi1> to vector<8x256xi32>
    %5 = arith.sitofp %4 : vector<8x256xi32> to vector<8x256xf32>
    %6 = arith.mulf %0, %5 : vector<8x256xf32>
    %cst = arith.constant dense<0.000000e+00> : vector<8xf32>
    %7 = vector.multi_reduction <add>, %6, %cst [1] : vector<8x256xf32> to vector<8xf32>
    %8 = vector.shape_cast %7 : vector<8xf32> to vector<8x1xf32>
    %cst_1 = arith.constant 3.906250e-03 : f32
    %9 = vector.broadcast %cst_1 : f32 to vector<8x1xf32>
    %10 = arith.mulf %8, %9 : vector<8x1xf32>
    %11 = vector.broadcast %10 : vector<8x1xf32> to vector<8x256xf32>
    %12 = arith.subf %0, %11 : vector<8x256xf32>
    %13 = arith.mulf %12, %5 : vector<8x256xf32>
    %14 = arith.mulf %13, %13 : vector<8x256xf32>
    %cst_2 = arith.constant dense<0.000000e+00> : vector<8xf32>
    %15 = vector.multi_reduction <add>, %14, %cst_2 [1] : vector<8x256xf32> to vector<8xf32>
    %16 = vector.shape_cast %15 : vector<8xf32> to vector<8x1xf32>
    %cst_3 = arith.constant 3.906250e-03 : f32
    %17 = vector.broadcast %cst_3 : f32 to vector<8x1xf32>
    %18 = arith.mulf %16, %17 : vector<8x1xf32>
    %cst_4 = arith.constant 9.99999997E-7 : f32
    %19 = vector.broadcast %cst_4 : f32 to vector<8x1xf32>
    %20 = arith.addf %18, %19 : vector<8x1xf32>
    %21 = math.rsqrt %20 : vector<8x1xf32>
    %22 = vector.broadcast %21 : vector<8x1xf32> to vector<8x256xf32>
    %23 = arith.mulf %13, %22 : vector<8x256xf32>
    %c0_5 = arith.constant 0 : index
    %c0_6 = arith.constant 0 : index
    %24 = vector.load %arg2[%c0_5, %c0_6] : memref<1x256xf32, #tpu.memory_space<vmem>>, vector<1x256xf32>
    %25 = vector.broadcast %24 : vector<1x256xf32> to vector<8x256xf32>
    %26 = arith.mulf %23, %25 : vector<8x256xf32>
    %c0_7 = arith.constant 0 : index
    %c0_8 = arith.constant 0 : index
    %27 = vector.load %arg3[%c0_7, %c0_8] : memref<1x256xf32, #tpu.memory_space<vmem>>, vector<1x256xf32>
    %28 = vector.broadcast %27 : vector<1x256xf32> to vector<8x256xf32>
    %29 = arith.addf %26, %28 : vector<8x256xf32>
    %c0_9 = arith.constant 0 : index
    %c0_10 = arith.constant 0 : index
    %30 = vector.load %arg4[%c0_9, %c0_10] : memref<8x256xf32, #tpu.memory_space<vmem>>, vector<8x256xf32>
    tpu.vector_store %arg4[%c0_9, %c0_10], %29 {strides = array<i32>} : memref<8x256xf32, #tpu.memory_space<vmem>>, vector<8x256xf32>,
    return
  }
  func.func @transform_0(%arg0: i32) -> (i32, i32) {
    %c0_i32 = arith.constant 0 : i32
    %c0_i32_0 = arith.constant 0 : i32
    return %arg0, %c0_i32 : i32, i32
  }
  func.func @transform_1(%arg0: i32) -> (i32, i32) {
    %c0_i32 = arith.constant 0 : i32
    %c0_i32_0 = arith.constant 0 : i32
    %c0_i32_1 = arith.constant 0 : i32
    return %c0_i32, %c0_i32_0 : i32, i32
  }
  func.func @transform_2(%arg0: i32) -> (i32, i32) {
    %c0_i32 = arith.constant 0 : i32
    %c0_i32_0 = arith.constant 0 : i32
    %c0_i32_1 = arith.constant 0 : i32
    return %c0_i32, %c0_i32_0 : i32, i32
  }
  func.func @transform_3(%arg0: i32) -> (i32, i32) {
    %c0_i32 = arith.constant 0 : i32
    %c0_i32_0 = arith.constant 0 : i32
    return %arg0, %c0_i32 : i32, i32
  }
}

</mosaic_0001>

<bundles_post_ra>
// kernel: layernorm_pallas.1
= control target key start
LH: loop header
LB: loop body
LE: loop exit
PB: predicated region body
PF: predicated region fallthrough
CT: control target
= control target key end

     0   :  { %8 = vsyncpa [#allocation3], 0  ;;  %s237_s0 = inlined_call_operand.hbm [shape: f32[8,256], index: 0, kind: input, shape index: {}]   ;;  %s238_s1 = inlined_call_operand.vmem [shape: f32[1,256], index: 1, kind: input, shape index: {}]   ;;  %s239_s2 = inlined_call_operand.hbm [shape: f32[1,256], index: 2, kind: input, shape index: {}]   ;;  %s240_s3 = inlined_call_operand.hbm [shape: f32[8,256], index: 3, kind: output, shape index: {}]  }
   0x1   :  { %9 = vsyncpa [#allocation6], 0 }
   0x2   :  { %10 = vsyncpa [#allocation4], 0  ;;  %s16_s14 = sshll.u32 %s237_s0, 4  ;;  %s202_s15 = smov [#allocation2]   ;;  %s17_s14 = int_to_ptr.hbm [resolvable:$true] %s16_s14 }
   0x3   :  { %s18_s16 = sshll.u32 %s202_s15, 4  ;;  %s29_s19 = sshll.u32 %s239_s2, 4  ;;  %s19_s16 = int_to_ptr.vmem [resolvable:$true] %s18_s16  ;;  %s30_s19 = int_to_ptr.hbm [resolvable:$true] %s29_s19 }
   0x4   :  { %21 = dma.hbm_to_vmem [thread:$0]  %s17_s14, 256, %s19_s16, [#allocation3]  }
   0x5   :  { %s203_s20 = smov [#allocation5]  }
   0x6   :  { %s31_s21 = sshll.u32 %s203_s20, 4  ;;  %s32_s21 = int_to_ptr.vmem [resolvable:$true] %s31_s21 }
   0x7   :  { %34 = dma.hbm_to_vmem [thread:$0]  %s30_s19, 32, %s32_s21, [#allocation6]  }
   0x8   :  { %196 = dma.done.wait [#allocation3], 256  }
   0x9   :  { %197 = vsyncadd [#allocation3], 4294967040 }
   0xa   :  { %198 = dma.done.wait [#allocation6], 32  }
   0xb   :  { %199 = vsyncadd [#allocation6], 4294967264  ;;  %v43_v0 = vld [vmem:[#allocation2] sm:$0xff]  ;;  %v44_v1 = vld [vmem:[#allocation2 + $0x8] sm:$0xff]  ;;  %s204_s22 = smov [#allocation7]   ;;  %s108_s26 = sshll.u32 %s240_s3, 4  ;;  %s109_s26 = int_to_ptr.hbm [resolvable:$true] %s108_s26 }
   0xc   :  { %v56_v2 = vadd.f32 %v44_v1, %v43_v0  ;;  %v83_v18 = vld [vmem:[%s238_s1] sm:$0x3]  ;;  %v91_v20 = vld [vmem:[#allocation5] sm:$0x3]  ;;  %s106_s23 = sshll.u32 %s204_s22, 4  ;;  %s107_s23 = int_to_ptr.vmem [resolvable:$true] %s106_s23 }
   0xd   :  { %v85_v21 = vperm.slane %v83_v18, 0  ;;  %v86_v22 = vperm.slane %v83_v18, 1  ;;  %v93_v26 = vperm.slane %v91_v20, 0  ;;  %v94_v27 = vperm.slane %v91_v20, 1 }
   0xe   :  { %57 = vadd.xlane.f32.xlu0 %v56_v2 }
  0x81   :  { %v58_v3 = vpop.xlane.xlu0 %57 }
  0x82   :  { %v59_v4 = vmul.f32 0.00390625, %v58_v3 }
  0x84   :  { %v60_v5 = vsub.f32 %v43_v0, %v59_v4  ;;  %v61_v6 = vsub.f32 %v44_v1, %v59_v4 }
  0x86   :  { %v64_v7 = vmul.f32 %v60_v5, %v60_v5  ;;  %v65_v8 = vmul.f32 %v61_v6, %v61_v6 }
  0x88   :  { %v66_v9 = vadd.f32 %v65_v8, %v64_v7 }
  0x8a   :  { %67 = vadd.xlane.f32.xlu0 %v66_v9 }
  0xfd   :  { %v68_v10 = vpop.xlane.xlu0 %67 }
  0xfe   :  { %v69_v11 = vmul.f32 0.00390625, %v68_v10 }
 0x100   :  { %v70_v12 = vadd.f32 1e-06, %v69_v11 }
 0x102   :  { %122 = vrsqrt.f32 %v70_v12  ;;  %vm77_vm1 = vweird.f32 %v70_v12 }
 0x108   :  { %v123_v13 = vpop.eup %122 }
 0x109   :  { %v72_v14 = vmul.f32 %v123_v13, %v70_v12  ;;  %vm78_vm0 = vweird.f32 %v123_v13 }
 0x10a   :  { %vm79_vm2 = vmor %vm77_vm1, %vm78_vm0 }
 0x10b   :  { %v73_v15 = vmul.f32 %v123_v13, %v72_v14 }
 0x10d   :  { %v74_v16 = vmul.f32 0.5, %v73_v15 }
 0x10f   :  { %v75_v17 = vsub.f32 1.5, %v74_v16 }
 0x111   :  { %v76_v19 = vmul.f32 %v123_v13, %v75_v17 }
 0x113   :  { %v80_v23 = vsel %vm79_vm2, %v123_v13, %v76_v19 }
 0x114   :  { %v81_v24 = vmul.f32 %v80_v23, %v60_v5  ;;  %v82_v25 = vmul.f32 %v80_v23, %v61_v6 }
 0x116   :  { %v89_v28 = vmul.f32 %v85_v21, %v81_v24  ;;  %v90_v29 = vmul.f32 %v86_v22, %v82_v25 }
 0x118   :  { %v97_v30 = vadd.f32 %v93_v26, %v89_v28  ;;  %v98_v31 = vadd.f32 %v94_v27, %v90_v29 }
 0x11a   :  { %99 = vst [vmem:[#allocation7] sm:$0xff] %v97_v30 }
 0x11b   :  { %100 = vst [vmem:[#allocation7 + $0x8] sm:$0xff] %v98_v31 }
 0x11c   :  { %111 = dma.vmem_to_hbm [thread:$0]  %s107_s23, 256, %s109_s26, [#allocation4]  }
 0x11d   :  { %200 = dma.done.wait [#allocation4], 256  }
 0x11e   :  { %201 = vsyncadd [#allocation4], 4294967040 }
 0x11f   :  { %116 = vsyncpa [#allocation3], 1 }
 0x120   :  { %117 = vsyncpa [#allocation6], 1 }
 0x121   :  { %118 = vsyncpa [#allocation4], 1 }

</bundles_post_ra>
